<compile_context>
chip_gen: v7x
topology: tpu7x:2x2x1
jax: 0.10.0
libtpu: 0.0.40
codegen_flags: <defaults>
</compile_context>

<pallas_src>
import jax
import jax.numpy as jnp
from jax.experimental import pallas as pl
from jax.experimental.pallas import tpu as pltpu


N_TRACK = 10
N_WAYPOINTS = 3
HALF_FEATURES = N_TRACK * 2        # 20 (one boundary, flattened)
IN_FEATURES = HALF_FEATURES * 2    # 40
HIDDEN = 64
OUT_FEATURES = N_WAYPOINTS * 2     # 6
OUT_PADDED = 8                     # small padded output width (masked vst, tiny HBM writeback)


def _round_up(x, m):
    return (x + m - 1) // m * m


def mlp_planner_kernel(xl_ref, xr_ref, w1l_ref, w1r_ref, b1_ref, w2_ref, b2_ref,
                       o_ref):
    xl = xl_ref[...]                                  # (TB, 20)
    xr = xr_ref[...]                                  # (TB, 20)
    n = IN_FEATURES

    # Per-sample standardization over the full 40-feature vector, computed
    # from the two halves without concatenating them.
    total = jnp.sum(xl, axis=1, keepdims=True) + jnp.sum(xr, axis=1, keepdims=True)
    mean = total * (1.0 / n)                          # (TB, 1)
    cl = xl - mean
    cr = xr - mean
    sq = (jnp.sum(cl * cl, axis=1, keepdims=True)
          + jnp.sum(cr * cr, axis=1, keepdims=True))
    std = jnp.sqrt(sq * (1.0 / (n - 1)))              # unbiased, matches torch.std
    inv = pl.reciprocal(std + 1e-8, approx=False)     # exact: matches torch division
    cl = cl * inv
    cr = cr * inv

    # fc1 (split weight: x @ W1 == xl @ W1[:20] + xr @ W1[20:]) + bias + ReLU
    h = (jnp.dot(cl, w1l_ref[...], preferred_element_type=jnp.float32)
         + jnp.dot(cr, w1r_ref[...], preferred_element_type=jnp.float32)
         + b1_ref[...])                               # (TB, 64)
    h = jnp.maximum(h, 0.0)

    # fc2 into the zero-padded 8-wide output
    y = jnp.dot(h, w2_ref[...], preferred_element_type=jnp.float32) + b2_ref[...]
    o_ref[...] = y.astype(o_ref.dtype)                # (TB, 8)


def mlp_planner_forward(track_left, track_right, params, *, tile_b=4096):
    """track_left, track_right: (B, n_track, 2) -> waypoints (B, n_waypoints, 2)."""
    w1l, w1r, b1, w2p, b2p = params
    b = track_left.shape[0]

    xl = track_left.reshape(b, HALF_FEATURES).astype(jnp.float32)
    xr = track_right.reshape(b, HALF_FEATURES).astype(jnp.float32)

    # Batch tile: multiple of 8 sublanes.  Large default to amortize per-step
    # overhead, but capped so the grid has >= 2 steps for large B (lets v7x
    # shard across its 2 TensorCores).  No jnp.pad: Pallas handles the partial
    # last block (masked output writeback; OOB input reads are row-local only).
    tb = min(tile_b, _round_up(pl.cdiv(b, 2), 8))
    grid = (pl.cdiv(b, tb),)

    out = pl.pallas_call(
        mlp_planner_kernel,
        out_shape=jax.ShapeDtypeStruct((b, OUT_PADDED), jnp.float32),
        grid=grid,
        in_specs=[
            pl.BlockSpec((tb, HALF_FEATURES), lambda i: (i, 0)),          # xl
            pl.BlockSpec((tb, HALF_FEATURES), lambda i: (i, 0)),          # xr
            pl.BlockSpec((HALF_FEATURES, HIDDEN), lambda i: (0, 0)),      # w1 left half
            pl.BlockSpec((HALF_FEATURES, HIDDEN), lambda i: (0, 0)),      # w1 right half
            pl.BlockSpec((1, HIDDEN), lambda i: (0, 0)),                  # b1
            pl.BlockSpec((HIDDEN, OUT_PADDED), lambda i: (0, 0)),         # w2 (padded)
            pl.BlockSpec((1, OUT_PADDED), lambda i: (0, 0)),              # b2 (padded)
        ],
        out_specs=pl.BlockSpec((tb, OUT_PADDED), lambda i: (i, 0)),
        compiler_params=pltpu.CompilerParams(
            dimension_semantics=("parallel",)),
    )(xl, xr, w1l, w1r, b1, w2p, b2p)

    return out[:, :OUT_FEATURES].reshape(b, N_WAYPOINTS, 2)


def init_params(key):
    """nn.Linear-style init (U(-1/sqrt(fan_in), +1/sqrt(fan_in))).
    Returns raw (in, out)-layout weights; use pack_params() for the kernel."""
    k1, k2, k3, k4 = jax.random.split(key, 4)
    bound1 = 1.0 / jnp.sqrt(IN_FEATURES)
    bound2 = 1.0 / jnp.sqrt(HIDDEN)
    w1 = jax.random.uniform(k1, (IN_FEATURES, HIDDEN), jnp.float32, -bound1, bound1)
    b1 = jax.random.uniform(k2, (1, HIDDEN), jnp.float32, -bound1, bound1)
    w2 = jax.random.uniform(k3, (HIDDEN, OUT_FEATURES), jnp.float32, -bound2, bound2)
    b2 = jax.random.uniform(k4, (1, OUT_FEATURES), jnp.float32, -bound2, bound2)
    return w1, b1, w2, b2


def pack_params(raw_params):
    """Split fc1 weight and zero-pad fc2 weight/bias to OUT_PADDED output lanes."""
    w1, b1, w2, b2 = raw_params
    w1l = w1[:HALF_FEATURES]
    w1r = w1[HALF_FEATURES:]
    w2p = jnp.zeros((HIDDEN, OUT_PADDED), jnp.float32).at[:, :OUT_FEATURES].set(w2)
    b2p = jnp.zeros((1, OUT_PADDED), jnp.float32).at[:, :OUT_FEATURES].set(b2)
    return w1l, w1r, b1, w2p, b2p


def reference_forward(track_left, track_right, raw_params):
    """Pure-JAX reference of the PyTorch forward."""
    w1, b1, w2, b2 = raw_params
    b = track_left.shape[0]
    x = jnp.concatenate([track_left, track_right], axis=1).reshape(b, -1)
    mean = jnp.mean(x, axis=1, keepdims=True)
    std = jnp.sqrt(jnp.sum((x - mean) ** 2, axis=1, keepdims=True) / (x.shape[1] - 1))
    x = (x - mean) / (std + 1e-8)
    x = jnp.maximum(x @ w1 + b1, 0.0)
    x = x @ w2 + b2
    return x.reshape(b, N_WAYPOINTS, 2)


if __name__ == "__main__":
    key = jax.random.PRNGKey(0)
    kp, kl, kr = jax.random.split(key, 3)

    raw_params = init_params(kp)
    params = pack_params(raw_params)

    # Primary check: tiny batch (single partial block).
    B = 2
    track_left = jax.random.normal(kl, (B, N_TRACK, 2), jnp.float32)
    track_right = jax.random.normal(kr, (B, N_TRACK, 2), jnp.float32)

    waypoints = mlp_planner_forward(track_left, track_right, params)
    waypoints = jax.block_until_ready(waypoints)
    assert waypoints.shape == (B, N_WAYPOINTS, 2), waypoints.shape

    ref = reference_forward(track_left, track_right, raw_params)
    assert jnp.allclose(waypoints, ref, atol=1e-5, rtol=1e-5), (
        "mismatch vs reference", float(jnp.max(jnp.abs(waypoints - ref)))
    )

    # Secondary check: batch not a multiple of the tile -> multi-step grid with
    # a partial last block (exercises the no-jnp.pad path).
    B2 = 37
    kl2, kr2 = jax.random.split(jax.random.PRNGKey(1), 2)
    tl2 = jax.random.normal(kl2, (B2, N_TRACK, 2), jnp.float32)
    tr2 = jax.random.normal(kr2, (B2, N_TRACK, 2), jnp.float32)
    wp2 = jax.block_until_ready(mlp_planner_forward(tl2, tr2, params, tile_b=16))
    ref2 = reference_forward(tl2, tr2, raw_params)
    assert wp2.shape == (B2, N_WAYPOINTS, 2), wp2.shape
    assert jnp.allclose(wp2, ref2, atol=1e-5, rtol=1e-5), (
        "partial-block mismatch vs reference", float(jnp.max(jnp.abs(wp2 - ref2)))
    )

    print("KERNEL_OK")
</pallas_src>

<mosaic_0001>
module attributes {stable_mosaic.version = 11 : i64} {
  func.func @mlp_planner_kernel(%arg0: i32, %arg1: memref<8x20xf32, #tpu.memory_space<vmem>>, %arg2: memref<8x20xf32, #tpu.memory_space<vmem>>, %arg3: memref<20x64xf32, #tpu.memory_space<vmem>>, %arg4: memref<20x64xf32, #tpu.memory_space<vmem>>, %arg5: memref<1x64xf32, #tpu.memory_space<vmem>>, %arg6: memref<64x8xf32, #tpu.memory_space<vmem>>, %arg7: memref<1x8xf32, #tpu.memory_space<vmem>>, %arg8: memref<8x8xf32, #tpu.memory_space<vmem>>) attributes {dimension_semantics = [#tpu.dimension_semantics<parallel>], iteration_bounds = array<i64: 1>, scalar_prefetch = 0 : i64, scratch_operands = 0 : i64, tpu.core_type = #tpu.core_type<tc>, window_params = [{transform_indices = @transform_0, window_bounds = array<i64: 8, 20>}, {transform_indices = @transform_1, window_bounds = array<i64: 8, 20>}, {pipeline_mode = #tpu.pipeline_mode<synchronous>, transform_indices = @transform_2, window_bounds = array<i64: 20, 64>}, {pipeline_mode = #tpu.pipeline_mode<synchronous>, transform_indices = @transform_3, window_bounds = array<i64: 20, 64>}, {pipeline_mode = #tpu.pipeline_mode<synchronous>, transform_indices = @transform_4, window_bounds = array<i64: 1, 64>}, {pipeline_mode = #tpu.pipeline_mode<synchronous>, transform_indices = @transform_5, window_bounds = array<i64: 64, 8>}, {pipeline_mode = #tpu.pipeline_mode<synchronous>, transform_indices = @transform_6, window_bounds = array<i64: 1, 8>}, {transform_indices = @transform_7, window_bounds = array<i64: 8, 8>}]} {
    %c0 = arith.constant 0 : index
    %c0_0 = arith.constant 0 : index
    %0 = vector.load %arg1[%c0, %c0_0] : memref<8x20xf32, #tpu.memory_space<vmem>>, vector<8x20xf32>
    %c0_1 = arith.constant 0 : index
    %c0_2 = arith.constant 0 : index
    %1 = vector.load %arg2[%c0_1, %c0_2] : memref<8x20xf32, #tpu.memory_space<vmem>>, vector<8x20xf32>
    %cst = arith.constant dense<0.000000e+00> : vector<8xf32>
    %2 = vector.multi_reduction <add>, %0, %cst [1] : vector<8x20xf32> to vector<8xf32>
    %3 = vector.shape_cast %2 : vector<8xf32> to vector<8x1xf32>
    %cst_3 = arith.constant dense<0.000000e+00> : vector<8xf32>
    %4 = vector.multi_reduction <add>, %1, %cst_3 [1] : vector<8x20xf32> to vector<8xf32>
    %5 = vector.shape_cast %4 : vector<8xf32> to vector<8x1xf32>
    %6 = arith.addf %3, %5 : vector<8x1xf32>
    %cst_4 = arith.constant 2.500000e-02 : f32
    %7 = vector.broadcast %cst_4 : f32 to vector<8x1xf32>
    %8 = arith.mulf %6, %7 : vector<8x1xf32>
    %9 = vector.broadcast %8 : vector<8x1xf32> to vector<8x20xf32>
    %10 = arith.subf %0, %9 : vector<8x20xf32>
    %11 = vector.broadcast %8 : vector<8x1xf32> to vector<8x20xf32>
    %12 = arith.subf %1, %11 : vector<8x20xf32>
    %13 = arith.mulf %10, %10 : vector<8x20xf32>
    %cst_5 = arith.constant dense<0.000000e+00> : vector<8xf32>
    %14 = vector.multi_reduction <add>, %13, %cst_5 [1] : vector<8x20xf32> to vector<8xf32>
    %15 = vector.shape_cast %14 : vector<8xf32> to vector<8x1xf32>
    %16 = arith.mulf %12, %12 : vector<8x20xf32>
    %cst_6 = arith.constant dense<0.000000e+00> : vector<8xf32>
    %17 = vector.multi_reduction <add>, %16, %cst_6 [1] : vector<8x20xf32> to vector<8xf32>
    %18 = vector.shape_cast %17 : vector<8xf32> to vector<8x1xf32>
    %19 = arith.addf %15, %18 : vector<8x1xf32>
    %cst_7 = arith.constant 0.025641026 : f32
    %20 = vector.broadcast %cst_7 : f32 to vector<8x1xf32>
    %21 = arith.mulf %19, %20 : vector<8x1xf32>
    %22 = math.sqrt %21 : vector<8x1xf32>
    %cst_8 = arith.constant 9.99999993E-9 : f32
    %23 = vector.broadcast %cst_8 : f32 to vector<8x1xf32>
    %24 = arith.addf %22, %23 : vector<8x1xf32>
    %25 = tpu.reciprocal %24 : vector<8x1xf32> -> vector<8x1xf32>
    %26 = vector.broadcast %25 : vector<8x1xf32> to vector<8x20xf32>
    %27 = arith.mulf %10, %26 : vector<8x20xf32>
    %28 = vector.broadcast %25 : vector<8x1xf32> to vector<8x20xf32>
    %29 = arith.mulf %12, %28 : vector<8x20xf32>
    %c0_9 = arith.constant 0 : index
    %c0_10 = arith.constant 0 : index
    %30 = vector.load %arg3[%c0_9, %c0_10] : memref<20x64xf32, #tpu.memory_space<vmem>>, vector<20x64xf32>
    %cst_11 = arith.constant dense<0.000000e+00> : vector<8x64xf32>
    %31 = tpu.matmul %27, %30, %cst_11 {dimension_numbers = #tpu.dot_dimension_numbers<[1], [0], [0], [1], [0, 0, 1, 1], [], []>} : vector<8x20xf32>, vector<20x64xf32>, vector<8x64xf32> -> vector<8x64xf32>
    %c0_12 = arith.constant 0 : index
    %c0_13 = arith.constant 0 : index
    %32 = vector.load %arg4[%c0_12, %c0_13] : memref<20x64xf32, #tpu.memory_space<vmem>>, vector<20x64xf32>
    %cst_14 = arith.constant dense<0.000000e+00> : vector<8x64xf32>
    %33 = tpu.matmul %29, %32, %cst_14 {dimension_numbers = #tpu.dot_dimension_numbers<[1], [0], [0], [1], [0, 0, 1, 1], [], []>} : vector<8x20xf32>, vector<20x64xf32>, vector<8x64xf32> -> vector<8x64xf32>
    %34 = arith.addf %31, %33 : vector<8x64xf32>
    %c0_15 = arith.constant 0 : index
    %c0_16 = arith.constant 0 : index
    %35 = vector.load %arg5[%c0_15, %c0_16] : memref<1x64xf32, #tpu.memory_space<vmem>>, vector<1x64xf32>
    %36 = vector.broadcast %35 : vector<1x64xf32> to vector<8x64xf32>
    %37 = arith.addf %34, %36 : vector<8x64xf32>
    %cst_17 = arith.constant 0.000000e+00 : f32
    %38 = vector.broadcast %cst_17 : f32 to vector<8x64xf32>
    %39 = arith.maximumf %37, %38 : vector<8x64xf32>
    %c0_18 = arith.constant 0 : index
    %c0_19 = arith.constant 0 : index
    %40 = vector.load %arg6[%c0_18, %c0_19] : memref<64x8xf32, #tpu.memory_space<vmem>>, vector<64x8xf32>
    %cst_20 = arith.constant dense<0.000000e+00> : vector<8x8xf32>
    %41 = tpu.matmul %39, %40, %cst_20 {dimension_numbers = #tpu.dot_dimension_numbers<[1], [0], [0], [1], [0, 0, 1, 1], [], []>} : vector<8x64xf32>, vector<64x8xf32>, vector<8x8xf32> -> vector<8x8xf32>
    %c0_21 = arith.constant 0 : index
    %c0_22 = arith.constant 0 : index
    %42 = vector.load %arg7[%c0_21, %c0_22] : memref<1x8xf32, #tpu.memory_space<vmem>>, vector<1x8xf32>
    %43 = vector.broadcast %42 : vector<1x8xf32> to vector<8x8xf32>
    %44 = arith.addf %41, %43 : vector<8x8xf32>
    %c0_23 = arith.constant 0 : index
    %c0_24 = arith.constant 0 : index
    %45 = vector.load %arg8[%c0_23, %c0_24] : memref<8x8xf32, #tpu.memory_space<vmem>>, vector<8x8xf32>
    tpu.vector_store %arg8[%c0_23, %c0_24], %44 {strides = array<i32>} : memref<8x8xf32, #tpu.memory_space<vmem>>, vector<8x8xf32>,
    return
  }
  func.func @transform_0(%arg0: i32) -> (i32, i32) {
    %c0_i32 = arith.constant 0 : i32
    %c0_i32_0 = arith.constant 0 : i32
    return %arg0, %c0_i32 : i32, i32
  }
  func.func @transform_1(%arg0: i32) -> (i32, i32) {
    %c0_i32 = arith.constant 0 : i32
    %c0_i32_0 = arith.constant 0 : i32
    return %arg0, %c0_i32 : i32, i32
  }
  func.func @transform_2(%arg0: i32) -> (i32, i32) {
    %c0_i32 = arith.constant 0 : i32
    %c0_i32_0 = arith.constant 0 : i32
    %c0_i32_1 = arith.constant 0 : i32
    return %c0_i32, %c0_i32_0 : i32, i32
  }
  func.func @transform_3(%arg0: i32) -> (i32, i32) {
    %c0_i32 = arith.constant 0 : i32
    %c0_i32_0 = arith.constant 0 : i32
    %c0_i32_1 = arith.constant 0 : i32
    return %c0_i32, %c0_i32_0 : i32, i32
  }
  func.func @transform_4(%arg0: i32) -> (i32, i32) {
    %c0_i32 = arith.constant 0 : i32
    %c0_i32_0 = arith.constant 0 : i32
    %c0_i32_1 = arith.constant 0 : i32
    return %c0_i32, %c0_i32_0 : i32, i32
  }
  func.func @transform_5(%arg0: i32) -> (i32, i32) {
    %c0_i32 = arith.constant 0 : i32
    %c0_i32_0 = arith.constant 0 : i32
    %c0_i32_1 = arith.constant 0 : i32
    return %c0_i32, %c0_i32_0 : i32, i32
  }
  func.func @transform_6(%arg0: i32) -> (i32, i32) {
    %c0_i32 = arith.constant 0 : i32
    %c0_i32_0 = arith.constant 0 : i32
    %c0_i32_1 = arith.constant 0 : i32
    return %c0_i32, %c0_i32_0 : i32, i32
  }
  func.func @transform_7(%arg0: i32) -> (i32, i32) {
    %c0_i32 = arith.constant 0 : i32
    %c0_i32_0 = arith.constant 0 : i32
    return %arg0, %c0_i32 : i32, i32
  }
}

</mosaic_0001>

<bundles_post_ra>
// kernel: tpu_custom_call.1
= control target key start
LH: loop header
LB: loop body
LE: loop exit
PB: predicated region body
PF: predicated region fallthrough
CT: control target
= control target key end

     0   :  { %vm29_vm0 = vcmask 162816   ;;  %s572_s0 = inlined_call_operand.vmem [shape: f32[2,20], index: 0, kind: input, shape index: {}]   ;;  %s573_s1 = inlined_call_operand.vmem [shape: f32[2,20], index: 1, kind: input, shape index: {}]   ;;  %s574_s2 = inlined_call_operand.vmem [shape: f32[20,64], index: 2, kind: input, shape index: {}]   ;;  %s575_s3 = inlined_call_operand.vmem [shape: f32[20,64], index: 3, kind: input, shape index: {}]   ;;  %s576_s4 = inlined_call_operand.vmem [shape: f32[1,64], index: 4, kind: input, shape index: {}]   ;;  %s577_s5 = inlined_call_operand.vmem [shape: f32[64,8], index: 5, kind: input, shape index: {}]   ;;  %s578_s6 = inlined_call_operand.vmem [shape: f32[1,8], index: 6, kind: input, shape index: {}]   ;;  %s579_s7 = inlined_call_operand.hbm [shape: f32[2,8], index: 7, kind: output, shape index: {}]  }
   0x1   :  { %v27_v0 = vld [vmem:[%s572_s0] sm:$0xff] }
   0x2   :  { %v28_v1 = vld [vmem:[%s573_s1] sm:$0xff] }
   0x3   :  { %12 = vsyncpa [#allocation3], 0  ;;  %v30_v2 = vsel %vm29_vm0, %v27_v0, 0.0  ;;  %v33_v3 = vsel %vm29_vm0, %v28_v1, 0.0  ;;  %v64_v14 = vld [vmem:[%s575_s3] sm:$0xff]  ;;  %v65_v15 = vld [vmem:[%s575_s3 + $0x8] sm:$0xff] }
   0x4   :  { %31 = vadd.xlane.f32.xlu0 %v30_v2  ;;  %v449_v16 = vmov 0.0|0.0   ;;  %v398_v17 = vpack.c.bf16 %v65_v15, %v64_v14  ;;  %vm450_vm1 = vmmov 0   ;;  %v451_v18 = vmov 0.0   ;;  %v66_v19 = vld [vmem:[%s575_s3 + $0x10] sm:$0xf]  ;;  %v229_v20 = vld [vmem:[%s577_s5] sm:$0xff] }
   0x5   :  { %397 = vmatprep.subr.bf16.mxu1 %v449_v16  ;;  %403 = vmatprep.subr.bf16.mxu0 %v449_v16  ;;  %vm70_vm2 = vcmask 1043456   ;;  %v230_v21 = vld [vmem:[%s577_s5 + $0x8] sm:$0xff]  ;;  %v61_v33 = vld [vmem:[%s574_s2] sm:$0xff]  ;;  %v63_v38 = vld [vmem:[%s574_s2 + $0x10] sm:$0xf]  ;;  %vm244_vm5 = vcmask 523264  }
   0x6   :  { %366 = vmatprep.mubr.msk.f32.mxu1 %vm450_vm1, %v451_v18  ;;  %394 = vmatprep.mubr.msk.f32.mxu0 %vm450_vm1, %v451_v18  ;;  %v404_v22 = vpack.c.bf16 %v230_v21, %v229_v20  ;;  %v62_v34 = vld [vmem:[%s574_s2 + $0x8] sm:$0xff]  ;;  %v231_v40 = vld [vmem:[%s577_s5 + $0x10] sm:$0xff]  ;;  %v232_v41 = vld [vmem:[%s577_s5 + $0x18] sm:$0xff]  ;;  %vm318_vm6 = vcmask 64512  }
   0x7   :  { %399 = vmatpush3.bf16.msra.mxu1 %v398_v17  ;;  %v401_v36 = vpack.c.bf16 %v62_v34, %v61_v33  ;;  %v407_v42 = vpack.c.bf16 %v232_v41, %v231_v40  ;;  %v233_v43 = vld [vmem:[%s577_s5 + $0x20] sm:$0xff]  ;;  %v234_v44 = vld [vmem:[%s577_s5 + $0x28] sm:$0xff]  ;;  %v235_v46 = vld [vmem:[%s577_s5 + $0x30] sm:$0xff] }
   0x8   :  { %34 = vadd.xlane.f32.xlu0 %v33_v3  ;;  %364 = vmatprep.subr.mxu1 %v451_v18  ;;  %v410_v45 = vpack.c.bf16 %v234_v44, %v233_v43  ;;  %v236_v47 = vld [vmem:[%s577_s5 + $0x38] sm:$0xff]  ;;  %v340_v52 = vld [vmem:[%s576_s4] ss:$0 sm:$0xff] }
   0x9   :  { %405 = vmatpush3.bf16.msra.mxu0 %v404_v22  ;;  %v413_v48 = vpack.c.bf16 %v236_v47, %v235_v46  ;;  %v341_v57 = vld [vmem:[%s578_s6] ss:$0 sm:$0xff] }
   0xa   :  { %406 = vmatprep.subr.bf16.mxu0 %v449_v16 }
   0xb   :  { %365 = vmatpush3.msk.msra.mxu1 %vm70_vm2, %v66_v19 }
   0xc   :  { %400 = vmatprep.subr.bf16.mxu1 %v449_v16 }
   0xd   :  { %408 = vmatpush3.bf16.msra.mxu0 %v407_v42 }
   0xe   :  { %409 = vmatprep.subr.bf16.mxu0 %v449_v16 }
  0x11   :  { %411 = vmatpush3.bf16.msra.mxu0 %v410_v45 }
  0x12   :  { %412 = vmatprep.subr.bf16.mxu0 %v449_v16 }
  0x15   :  { %414 = vmatpush3.bf16.msra.mxu0 %v413_v48 }
  0x91   :  { %v32_v4 = vpop.xlane.xlu0 %31 }
  0x95   :  { %v35_v5 = vpop.xlane.xlu0 %34 }
  0x96   :  { %v36_v6 = vadd.f32 %v35_v5, %v32_v4 }
  0x98   :  { %v37_v7 = vmul.f32 0.025, %v36_v6 }
  0x9a   :  { %v38_v8 = vsub.f32 %v27_v0, %v37_v7  ;;  %v39_v9 = vsub.f32 %v28_v1, %v37_v7 }
  0x9c   :  { %v40_v10 = vmul.f32 %v38_v8, %v38_v8  ;;  %v44_v12 = vmul.f32 %v39_v9, %v39_v9 }
  0x9e   :  { %v41_v11 = vsel %vm29_vm0, %v40_v10, 0.0  ;;  %v45_v13 = vsel %vm29_vm0, %v44_v12, 0.0 }
  0x9f   :  { %42 = vadd.xlane.f32.xlu1 %v41_v11 }
  0xa3   :  { %46 = vadd.xlane.f32.xlu1 %v45_v13 }
 0x12c   :  { %v43_v23 = vpop.xlane.xlu1 %42 }
 0x130   :  { %v47_v24 = vpop.xlane.xlu1 %46 }
 0x131   :  { %v48_v25 = vadd.f32 %v47_v24, %v43_v23 }
 0x133   :  { %v49_v26 = vmul.f32 0.025641026, %v48_v25 }
 0x135   :  { %421 = vrsqrt.f32 %v49_v26  ;;  %vm52_vm3 = vcmp.eq.f32.partialorder %v49_v26, inf  ;;  %v55_v29 = vand.u32 2147483648, %v49_v26  ;;  %vm54_vm4 = vcmp.eq.f32.partialorder %v49_v26, 0.0 }
 0x13f   :  { %v422_v27 = vpop.eup %421 }
 0x140   :  { %v51_v28 = vmul.f32 %v422_v27, %v49_v26 }
 0x142   :  { %v53_v30 = vsel %vm52_vm3, %v49_v26, %v51_v28 }
 0x143   :  { %v56_v31 = vsel %vm54_vm4, %v55_v29, %v53_v30 }
 0x144   :  { %v57_v32 = vadd.f32 1e-08, %v56_v31 }
 0x146   :  { %423 = vrcp.f32 %v57_v32 }
 0x150   :  { %v424_v35 = vpop.eup %423 }
 0x151   :  { %v60_v37 = vmul.f32 %v424_v35, %v39_v9  ;;  %v59_v39 = vmul.f32 %v424_v35, %v38_v8 }
 0x153   :  { %367 = vmatmul.mubr.msk.f32.vlgmr.msra.gmra.mrb[0].mxu1 %vm29_vm0, %v60_v37 }
 0x154   :  { %402 = vmatpush3.bf16.msra.mxu1 %v401_v36  ;;  %375 = vmatprep.mubr.msk.f32.mxu1 %vm450_vm1, %v451_v18 }
 0x155   :  { %373 = vmatprep.subr.mxu1 %v451_v18 }
 0x158   :  { %374 = vmatpush3.msk.msra.mxu1 %vm70_vm2, %v63_v38 }
 0x159   :  { %376 = vmatmul.mubr.msk.f32.vlgmr.msra.gmra.mrb[2].mxu1 %vm29_vm0, %v59_v39 }
 0x226   :  { %v140_v49 = vpop.f32.mrb[0].mxu1 }
 0x227   :  { %v368_v50 = vpop.f32.mrb[1].mxu1 }
 0x22c   :  { %v216_v51 = vpop.f32.mrb[2].mxu1 }
 0x22d   :  { %v217_v53 = vadd.f32 %v216_v51, %v140_v49  ;;  %v377_v54 = vpop.f32.mrb[3].mxu1 }
 0x22f   :  { %v227_v55 = vadd.f32 %v340_v52, %v217_v53 }
 0x231   :  { %v228_v56 = vmax.f32 %v227_v55, 0.0 }
 0x233   :  { %395 = vmatmul.mubr.msk.f32.vlgmr.msra.gmra.mrb[0].mxu0 %vm244_vm5, %v228_v56 }
 0x306   :  { %v314_v58 = vpop.f32.mrb[0].mxu0 }
 0x307   :  { %v315_v59 = vadd.f32 %v341_v57, %v314_v58  ;;  %v396_v60 = vpop.f32.mrb[1].mxu0 }
 0x309   :  { %319 = vst.msk [vmem:[#allocation2] sm:$0xff] %vm318_vm6, %v315_v59 }
 0x30a   :  { %324 = vsyncadd [#allocation3], 96  ;;  %s452_s5 = smov [#allocation2]  }
 0x30b   :  { %s325_s8 = sshll.u32 %s452_s5, 4  ;;  %s326_s8 = int_to_ptr.vmem [resolvable:$true] %s325_s8 }
 0x30c   :  { %s425_s4 = scalar_lea.vmem %s326_s8, 32  ;;  %s429_s9 = scalar_lea.vmem %s326_s8, 128 }
 0x30d   :  { %p426_p0 = scmp.ne.s32.totalorder %s326_s8, %s425_s4  ;;  %p430_p1 = scmp.lt.s32.totalorder %s326_s8, %s326_s8 }
 0x30e   :  { %p431_p2 = scmp.lt.s32.totalorder %s429_s9, %s425_s4 }
 0x310   :  { %p432_p3 = por %p431_p2, %p430_p1 }
 0x312   :  { %p433_p4 = pnand %p432_p3, %p426_p0 }
 0x314   :  { %436 = shalt.err (!%p433_p4)
}
 0x315   :  { %s437_s6 = scalar_lea.hbm %s579_s7, 32 }
 0x316   :  { %p438_p5 = scmp.ne.s32.totalorder %s579_s7, %s437_s6  ;;  %p441_p6 = scmp.lt.u32.totalorder %s437_s6, %s579_s7 }
 0x318   :  { %p443_p7 = pnand %p441_p6, %p438_p5 }
 0x31a   :  { %446 = shalt.err (!%p443_p7)
}
 0x31b   :  { %s453_s15 = smov 32   ;;  %s454_s16 = smov 2  }
 0x31c   :  { %331 = dma.vmem_to_hbm [thread:$0]  %s326_s8, 32, %s579_s7, [#allocation3], %s453_s15, %s453_s15, %s454_s16  }
 0x31d   :  { %447 = dma.done.wait [#allocation3], 128  }
 0x31e   :  { %448 = vsyncadd [#allocation3], 4294967168 }
 0x31f   :  { %335 = vsyncpa [#allocation3], 1 }

</bundles_post_ra>
